<compile_context>
chip_gen: v7x
topology: tpu7x:2x2x1
jax: 0.10.0
libtpu: 0.0.40
codegen_flags: <defaults>
</compile_context>

<pallas_src>
import jax
import jax.numpy as jnp
from jax.experimental import pallas as pl
from jax.experimental.pallas import tpu as pltpu


def film_kernel(gamma_ref, beta_ref, feat_ref, out_ref):
    # gamma_ref / beta_ref: (tr, 1)   f32, per-row modulation (resident across HW tiles)
    # feat_ref  / out_ref : (tr, thw) feature dtype, HW flattened onto lanes
    # FMA runs in f32 (gamma/beta are f32), cast once on store.
    out_ref[...] = (feat_ref[...] * gamma_ref[...] + beta_ref[...]).astype(out_ref.dtype)


def _choose_tiles(rows, HW, itemsize, budget_bytes=4 << 20):
    """Pick (row_tile, hw_tile) for a ~budget_bytes lane-dense block.

    hw_tile prefers a multiple of 128 that evenly divides HW (no ragged edge,
    every store is an unmasked vst); row_tile is a multiple of the sublane
    packing (8 for f32, 16 for bf16, 32 for int8) or the full row extent.
    """
    budget_elems = max(1, budget_bytes // itemsize)
    sub = max(8, 32 // itemsize)  # sublane packing per dtype

    # --- lane (HW) tile ---
    if HW <= 128:
        # Late UNet stages (e.g. 8x8=64): last dim below 128 means masked
        # vst.msk stores. Accepted here; keeping such stages channels-last
        # (lane dim = C) would be the layout fix if it ever dominates.
        thw = HW
    else:
        cap = max(128, min(HW, (budget_elems // sub) // 128 * 128))
        if HW % 128 == 0:
            # Largest multiple of 128 that divides HW exactly and fits the cap.
            thw = 128
            for k in range(cap // 128, 0, -1):
                cand = k * 128
                if HW % cand == 0:
                    thw = cand
                    break
        else:
            # HW not 128-aligned: take the biggest 128-multiple (or full HW);
            # the ragged tail is masked but still correct for elementwise ops.
            thw = cap

    # --- row (B*C) tile ---
    max_tr = max(sub, (budget_elems // thw) // sub * sub)
    if rows <= max_tr:
        tr = rows  # full extent: always a legal block shape
        # Megacore: if the whole problem fits in a single block, split the
        # row axis so both v7x TensorCores get a parallel block.
        if -(-HW // thw) == 1 and rows >= 2 * sub:
            half = -(-rows // 2)
            tr = -(-half // sub) * sub
    else:
        tr = max_tr  # multiple of sublane packing; ragged tail is masked

    return tr, thw


def film_forward(features, condition, weight, bias, *, donate_features=False):
    """features: (B, C, H, W) NCHW; condition: (B, D);
    weight: (2C, D) PyTorch Linear layout; bias: (2C,)."""
    B, C, H, W = features.shape
    HW = H * W
    rows = B * C

    # Hoisted affine: gamma/beta computed once in f32 and kept f32 for the
    # in-kernel FMA (cast to the feature dtype only on the output store).
    gb = (jnp.dot(condition, weight.T, preferred_element_type=jnp.float32)
          + bias.astype(jnp.float32))                         # (B, 2C) f32
    gamma = gb[:, :C].reshape(rows, 1)                        # (B*C, 1)
    beta = gb[:, C:].reshape(rows, 1)                         # (B*C, 1)

    # Free reshape (no data movement): NCHW -> (B*C, HW).
    feat = features.reshape(rows, HW)

    itemsize = jnp.dtype(features.dtype).itemsize
    tr, thw = _choose_tiles(rows, HW, itemsize)
    n_rows = pl.cdiv(rows, tr)
    n_hw = pl.cdiv(HW, thw)

    feat_bytes = rows * HW * itemsize
    cost = pl.CostEstimate(
        flops=2 * rows * HW,
        transcendentals=0,
        bytes_accessed=2 * feat_bytes + 2 * rows * 4,
    )

    out = pl.pallas_call(
        film_kernel,
        out_shape=jax.ShapeDtypeStruct((rows, HW), features.dtype),
        grid_spec=pltpu.PrefetchScalarGridSpec(
            num_scalar_prefetch=0,
            grid=(n_rows, n_hw),
            in_specs=[
                pl.BlockSpec((tr, 1), lambda r, t: (r, 0)),    # gamma (resident over HW tiles)
                pl.BlockSpec((tr, 1), lambda r, t: (r, 0)),    # beta  (resident over HW tiles)
                pl.BlockSpec((tr, thw), lambda r, t: (r, t)),  # feature tile
            ],
            out_specs=pl.BlockSpec((tr, thw), lambda r, t: (r, t)),
        ),
        compiler_params=pltpu.CompilerParams(
            dimension_semantics=("parallel", "parallel"),
            vmem_limit_bytes=48 * 1024 * 1024,
        ),
        cost_estimate=cost,
        # Alias features -> out only when the caller no longer needs features
        # (drops the separate output allocation inside a UNet block).
        input_output_aliases=({2: 0} if donate_features else {}),
    )(gamma, beta, feat)

    # Free reshape back to NCHW.
    return out.reshape(B, C, H, W)


def film_reference(features, condition, weight, bias):
    gb = condition @ weight.T + bias                 # (B, 2C)
    C = features.shape[1]
    gamma = gb[:, :C][:, :, None, None]
    beta = gb[:, C:][:, :, None, None]
    return features * gamma + beta


if __name__ == "__main__":
    B, C, H, W = 2, 4, 16, 16
    context_dim = 32

    key = jax.random.PRNGKey(0)
    k1, k2, k3, k4 = jax.random.split(key, 4)

    features = jax.random.normal(k1, (B, C, H, W), dtype=jnp.float32)
    condition = jax.random.normal(k2, (B, context_dim), dtype=jnp.float32)
    # deterministic "Linear" params (PyTorch layout: weight (out, in), bias (out,))
    weight = jax.random.normal(k3, (2 * C, context_dim), dtype=jnp.float32) * 0.1
    bias = jax.random.normal(k4, (2 * C,), dtype=jnp.float32) * 0.1

    out = film_forward(features, condition, weight, bias)
    jax.block_until_ready(out)

    ref = film_reference(features, condition, weight, bias)
    assert out.shape == (B, C, H, W)
    assert jnp.allclose(out, ref, atol=1e-5, rtol=1e-5), "mismatch vs reference"

    print("KERNEL_OK")
</pallas_src>

<mosaic_0001>
module attributes {stable_mosaic.version = 11 : i64} {
  func.func @film_kernel(%arg0: i32, %arg1: i32, %arg2: memref<8x1xf32, #tpu.memory_space<vmem>>, %arg3: memref<8x1xf32, #tpu.memory_space<vmem>>, %arg4: memref<8x256xf32, #tpu.memory_space<vmem>>, %arg5: memref<8x256xf32, #tpu.memory_space<vmem>>) attributes {dimension_semantics = [#tpu.dimension_semantics<parallel>, #tpu.dimension_semantics<parallel>], iteration_bounds = array<i64: 1, 1>, scalar_prefetch = 0 : i64, scratch_operands = 0 : i64, tpu.core_type = #tpu.core_type<tc>, window_params = [{transform_indices = @transform_0, window_bounds = array<i64: 8, 1>}, {transform_indices = @transform_1, window_bounds = array<i64: 8, 1>}, {transform_indices = @transform_2, window_bounds = array<i64: 8, 256>}, {transform_indices = @transform_3, window_bounds = array<i64: 8, 256>}]} {
    %c0 = arith.constant 0 : index
    %c0_0 = arith.constant 0 : index
    %0 = vector.load %arg4[%c0, %c0_0] : memref<8x256xf32, #tpu.memory_space<vmem>>, vector<8x256xf32>
    %c0_1 = arith.constant 0 : index
    %c0_2 = arith.constant 0 : index
    %1 = vector.load %arg2[%c0_1, %c0_2] : memref<8x1xf32, #tpu.memory_space<vmem>>, vector<8x1xf32>
    %2 = vector.broadcast %1 : vector<8x1xf32> to vector<8x256xf32>
    %3 = arith.mulf %0, %2 : vector<8x256xf32>
    %c0_3 = arith.constant 0 : index
    %c0_4 = arith.constant 0 : index
    %4 = vector.load %arg3[%c0_3, %c0_4] : memref<8x1xf32, #tpu.memory_space<vmem>>, vector<8x1xf32>
    %5 = vector.broadcast %4 : vector<8x1xf32> to vector<8x256xf32>
    %6 = arith.addf %3, %5 : vector<8x256xf32>
    %c0_5 = arith.constant 0 : index
    %c0_6 = arith.constant 0 : index
    %7 = vector.load %arg5[%c0_5, %c0_6] : memref<8x256xf32, #tpu.memory_space<vmem>>, vector<8x256xf32>
    tpu.vector_store %arg5[%c0_5, %c0_6], %6 {strides = array<i32>} : memref<8x256xf32, #tpu.memory_space<vmem>>, vector<8x256xf32>,
    return
  }
  func.func @transform_0(%arg0: i32, %arg1: i32) -> (i32, i32) {
    %c0_i32 = arith.constant 0 : i32
    %c0_i32_0 = arith.constant 0 : i32
    return %arg0, %c0_i32 : i32, i32
  }
  func.func @transform_1(%arg0: i32, %arg1: i32) -> (i32, i32) {
    %c0_i32 = arith.constant 0 : i32
    %c0_i32_0 = arith.constant 0 : i32
    return %arg0, %c0_i32 : i32, i32
  }
  func.func @transform_2(%arg0: i32, %arg1: i32) -> (i32, i32) {
    %c0_i32 = arith.constant 0 : i32
    return %arg0, %arg1 : i32, i32
  }
  func.func @transform_3(%arg0: i32, %arg1: i32) -> (i32, i32) {
    %c0_i32 = arith.constant 0 : i32
    return %arg0, %arg1 : i32, i32
  }
}

</mosaic_0001>

<bundles_post_ra>
// kernel: tpu_custom_call.1
= control target key start
LH: loop header
LB: loop body
LE: loop exit
PB: predicated region body
PF: predicated region fallthrough
CT: control target
= control target key end

     0   :  { %s122_s0 = inlined_call_operand.vmem [shape: f32[8,1], index: 0, kind: input, shape index: {}]   ;;  %s123_s1 = inlined_call_operand.vmem [shape: f32[8,1], index: 1, kind: input, shape index: {}]   ;;  %s124_s2 = inlined_call_operand.vmem [shape: f32[8,256], index: 2, kind: input, shape index: {}]   ;;  %s125_s3 = inlined_call_operand.hbm [shape: f32[8,256], index: 3, kind: output, shape index: {}]  }
   0x1   :  { %v17_v0 = vld [vmem:[%s122_s0] sm:$0xff] }
   0x2   :  { %8 = vsyncpa [#allocation3], 0  ;;  %v76_v1 = vmov 0   ;;  %v25_v2 = vld [vmem:[%s123_s1] sm:$0xff]  ;;  %v16_v5 = vld [vmem:[%s124_s2 + $0x8] sm:$0xff]  ;;  %s77_s20 = smov [#allocation2]  }
   0x3   :  { %51 = vset.pattern.permute.xlu0 %v76_v1  ;;  %v15_v4 = vld [vmem:[%s124_s2] sm:$0xff]  ;;  %s41_s0 = sshll.u32 %s77_s20, 4  ;;  %s42_s0 = int_to_ptr.vmem [resolvable:$true] %s41_s0 }
   0x4   :  { %20 = vperm.xlu0 %51, %v17_v0   ;;  %s52_s1 = scalar_lea.vmem %s42_s0, 256  ;;  %p57_p1 = scmp.lt.s32.totalorder %s42_s0, %s42_s0 }
   0x5   :  { %p53_p0 = scmp.ne.s32.totalorder %s42_s0, %s52_s1  ;;  %p58_p2 = scmp.lt.s32.totalorder %s52_s1, %s52_s1 }
   0x7   :  { %p59_p3 = por %p58_p2, %p57_p1 }
   0x8   :  { %28 = vperm.xlu0 %51, %v25_v2  }
   0x9   :  { %p60_p4 = pnand %p59_p3, %p53_p0 }
  0x83   :  { %v21_v3 = vpop.permute.xlu0 %20 }
  0x84   :  { %v23_v6 = vmul.f32 %v21_v3, %v15_v4  ;;  %v24_v7 = vmul.f32 %v21_v3, %v16_v5 }
  0x87   :  { %v29_v8 = vpop.permute.xlu0 %28 }
  0x88   :  { %v31_v9 = vadd.f32 %v29_v8, %v23_v6  ;;  %v32_v10 = vadd.f32 %v29_v8, %v24_v7 }
  0x8a   :  { %33 = vst [vmem:[#allocation2] sm:$0xff] %v31_v9  ;;  %34 = vst [vmem:[#allocation2 + $0x8] sm:$0xff] %v32_v10 }
  0x8b   :  { %63 = shalt.err (!%p60_p4)
}
  0x8c   :  { %s64_s2 = scalar_lea.hbm %s125_s3, 256 }
  0x8d   :  { %p65_p5 = scmp.ne.s32.totalorder %s125_s3, %s64_s2  ;;  %p68_p6 = scmp.lt.u32.totalorder %s64_s2, %s125_s3 }
  0x8f   :  { %p70_p7 = pnand %p68_p6, %p65_p5 }
  0x91   :  { %73 = shalt.err (!%p70_p7)
}
  0x92   :  { %44 = dma.vmem_to_hbm [thread:$0]  %s42_s0, 256, %s125_s3, [#allocation3]  }
  0x93   :  { %74 = dma.done.wait [#allocation3], 256  }
  0x94   :  { %75 = vsyncadd [#allocation3], 4294967040 }
  0x95   :  { %48 = vsyncpa [#allocation3], 1 }

</bundles_post_ra>
